<compile_context>
chip_gen: v5e
topology: v5e:2x2
jax: 0.10.0
libtpu: 0.0.40
codegen_flags: <defaults>
</compile_context>

<pallas_src>
import functools
import math

import jax
import jax.numpy as jnp
from jax.experimental import pallas as pl
from jax.experimental.pallas import tpu as pltpu

_GELU_C = math.sqrt(2.0 / math.pi)


def _new_gelu(x):
    # exact tanh-GELU from the PyTorch module
    return 0.5 * x * (1.0 + jnp.tanh(_GELU_C * (x + 0.044715 * x * x * x)))


def _round_up(n, m):
    return ((n + m - 1) // m) * m


def _tpu_config():
    """Return (vmem_limit_bytes, elementwise_dtype) chosen per TPU generation."""
    kind = ""
    try:
        kind = jax.devices()[0].device_kind.lower()
    except Exception:
        pass
    is_v7 = ("v7" in kind) or ("7x" in kind)
    has_bf16_vpu = is_v7 or ("v6" in kind)          # v6e/v7x have bf16 VPU/EUP

    vmem_cap = None
    try:
        vmem_cap = int(pltpu.get_tpu_info().vmem_capacity_bytes)
    except Exception:
        vmem_cap = None
    if vmem_cap is None:
        # v7x has 64 MiB/TC; v5e/v6e have 128 MiB.
        vmem_cap = (64 if is_v7 else 128) * 1024 * 1024

    # Leave ~16 MiB headroom for compiler-internal scratch / pipeline buffers.
    vmem_limit = max(32 * 1024 * 1024, vmem_cap - 16 * 1024 * 1024)
    ew_dtype = jnp.bfloat16 if has_bf16_vpu else jnp.float32
    return vmem_limit, ew_dtype


def mlp_kernel(x_ref, wfc_ref, bfc_ref, wproj_ref, bproj_ref, o_ref, *, ew_dtype):
    # x tile: (tm, C).  MXU matmuls in bf16 with f32 accumulation; bias/GELU in
    # `ew_dtype` (bf16 on v6e/v7x, f32 on v5e).
    x = x_ref[...].astype(jnp.bfloat16)

    h = jnp.dot(x, wfc_ref[...], preferred_element_type=jnp.float32)
    h = h.astype(ew_dtype) + bfc_ref[...].astype(ew_dtype)
    h = _new_gelu(h)

    y = jnp.dot(h.astype(jnp.bfloat16), wproj_ref[...],
                preferred_element_type=jnp.float32)
    y = y + bproj_ref[...]          # final bias add in f32

    # dropout is identity here (p = 0 / eval mode)
    o_ref[...] = y.astype(o_ref.dtype)


def mlp_forward(x, w_fc, b_fc, w_proj, b_proj, *, block_rows=512,
                ew_dtype=None, vmem_limit_bytes=None):
    """new_gelu(x @ w_fc + b_fc) @ w_proj + b_proj, dropout(p=0) == identity.

    x:      (..., C)                 e.g. (B, T, C)
    w_fc:   (C, H)  pre-transposed   (H = 4*C)
    b_fc:   (H,) or (1, H)
    w_proj: (H, C)  pre-transposed
    b_proj: (C,) or (1, C)
    """
    orig_shape = x.shape
    C = orig_shape[-1]
    H = w_fc.shape[1]
    M = 1
    for d in orig_shape[:-1]:
        M *= d

    auto_vmem, auto_ew = _tpu_config()
    if ew_dtype is None:
        ew_dtype = auto_ew
    if vmem_limit_bytes is None:
        vmem_limit_bytes = auto_vmem

    x2 = x.reshape(M, C)

    # bf16 operands for the MXU; biases stay f32 in HBM (cast in-kernel).
    w_fc_c = w_fc.astype(jnp.bfloat16)
    w_proj_c = w_proj.astype(jnp.bfloat16)
    b_fc_c = b_fc.reshape(1, H).astype(jnp.float32)
    b_proj_c = b_proj.reshape(1, C).astype(jnp.float32)

    # Row tile: block_rows (default 512, a multiple of 256/128 for MXU cadence);
    # shrink to a single 8-aligned tile for tiny inputs.  Pad M up to a tile
    # multiple instead of the old `tm = M` fallback (which could blow VMEM or
    # serialize the row axis on v7x megacore).
    block_rows = max(8, _round_up(block_rows, 8))
    tm = min(block_rows, _round_up(M, 8))
    M_pad = _round_up(M, tm)
    if M_pad != M:
        x2 = jnp.pad(x2, ((0, M_pad - M), (0, 0)))
    grid = (M_pad // tm,)

    kernel = functools.partial(mlp_kernel, ew_dtype=ew_dtype)

    def build(single_buffer_weights):
        # Weights/biases: constant block index -> fetched once across the row
        # grid.  Buffered(1) halves their resident VMEM (no double buffer).
        wkw = (dict(pipeline_mode=pl.Buffered(1))
               if single_buffer_weights else {})
        return pl.pallas_call(
            kernel,
            out_shape=jax.ShapeDtypeStruct((M_pad, C), x.dtype),
            grid_spec=pltpu.PrefetchScalarGridSpec(
                num_scalar_prefetch=0,
                grid=grid,
                in_specs=[
                    pl.BlockSpec((tm, C), lambda i: (i, 0)),
                    pl.BlockSpec((C, H), lambda i: (0, 0), **wkw),
                    pl.BlockSpec((1, H), lambda i: (0, 0), **wkw),
                    pl.BlockSpec((H, C), lambda i: (0, 0), **wkw),
                    pl.BlockSpec((1, C), lambda i: (0, 0), **wkw),
                ],
                out_specs=pl.BlockSpec((tm, C), lambda i: (i, 0)),
            ),
            compiler_params=pltpu.CompilerParams(
                dimension_semantics=("parallel",),
                vmem_limit_bytes=vmem_limit_bytes,
            ),
        )

    try:
        out2 = build(True)(x2, w_fc_c, b_fc_c, w_proj_c, b_proj_c)
    except Exception:
        # Fallback for jax versions where pipeline_mode=pl.Buffered(1) on a
        # constant-index operand is rejected; correctness is unchanged.
        out2 = build(False)(x2, w_fc_c, b_fc_c, w_proj_c, b_proj_c)

    if M_pad != M:
        out2 = out2[:M]
    return out2.reshape(orig_shape)


# -------- pure-JAX reference (same bf16-matmul / elementwise recipe) ---------
def ref_mlp(x, w_fc, b_fc, w_proj, b_proj, ew_dtype=jnp.float32):
    orig_shape = x.shape
    C = orig_shape[-1]
    x2 = x.reshape(-1, C).astype(jnp.bfloat16)
    h = jnp.dot(x2, w_fc.astype(jnp.bfloat16),
                preferred_element_type=jnp.float32)
    h = h.astype(ew_dtype) + b_fc.reshape(1, -1).astype(ew_dtype)
    h = _new_gelu(h)
    y = jnp.dot(h.astype(jnp.bfloat16), w_proj.astype(jnp.bfloat16),
                preferred_element_type=jnp.float32) + b_proj.reshape(1, -1)
    return y.astype(x.dtype).reshape(orig_shape)


if __name__ == "__main__":
    B, T, C = 2, 8, 32          # batch=2, seq=8, n_embd=32
    H = 4 * C

    key = jax.random.PRNGKey(0)
    k_x, k_wfc, k_bfc, k_wp, k_bp = jax.random.split(key, 5)

    x = jax.random.normal(k_x, (B, T, C), jnp.float32)
    # nn.Linear weights, pre-transposed to (in_features, out_features)
    w_fc = (0.02 * jax.random.normal(k_wfc, (C, H))).astype(jnp.float32)
    b_fc = (0.01 * jax.random.normal(k_bfc, (H,))).astype(jnp.float32)
    w_proj = (0.02 * jax.random.normal(k_wp, (H, C))).astype(jnp.float32)
    b_proj = (0.01 * jax.random.normal(k_bp, (C,))).astype(jnp.float32)

    _, ew_dtype = _tpu_config()

    out = mlp_forward(x, w_fc, b_fc, w_proj, b_proj)
    out = jax.block_until_ready(out)

    ref = ref_mlp(x, w_fc, b_fc, w_proj, b_proj, ew_dtype=ew_dtype)
    assert out.shape == (B, T, C)
    max_err = float(jnp.max(jnp.abs(out - ref)))
    assert jnp.allclose(out, ref, atol=2e-2, rtol=2e-2), max_err

    # TODO(synk): nn.Dropout is identity (p=0 / eval mode); stochastic dropout
    # would need pltpu.prng_* and is intentionally omitted for determinism.
    print("KERNEL_OK")
</pallas_src>

<mosaic_0001>
module attributes {stable_mosaic.version = 11 : i64} {
  func.func @mlp_kernel(%arg0: i32, %arg1: memref<16x32xf32, #tpu.memory_space<vmem>>, %arg2: memref<32x128xbf16, #tpu.memory_space<vmem>>, %arg3: memref<1x128xf32, #tpu.memory_space<vmem>>, %arg4: memref<128x32xbf16, #tpu.memory_space<vmem>>, %arg5: memref<1x32xf32, #tpu.memory_space<vmem>>, %arg6: memref<16x32xf32, #tpu.memory_space<vmem>>) attributes {dimension_semantics = [#tpu.dimension_semantics<parallel>], iteration_bounds = array<i64: 1>, scalar_prefetch = 0 : i64, scratch_operands = 0 : i64, tpu.core_type = #tpu.core_type<tc>, window_params = [{transform_indices = @transform_0, window_bounds = array<i64: 16, 32>}, {pipeline_mode = #tpu.pipeline_mode<synchronous>, transform_indices = @transform_1, window_bounds = array<i64: 32, 128>}, {pipeline_mode = #tpu.pipeline_mode<synchronous>, transform_indices = @transform_2, window_bounds = array<i64: 1, 128>}, {pipeline_mode = #tpu.pipeline_mode<synchronous>, transform_indices = @transform_3, window_bounds = array<i64: 128, 32>}, {pipeline_mode = #tpu.pipeline_mode<synchronous>, transform_indices = @transform_4, window_bounds = array<i64: 1, 32>}, {transform_indices = @transform_5, window_bounds = array<i64: 16, 32>}]} {
    %c0 = arith.constant 0 : index
    %c0_0 = arith.constant 0 : index
    %0 = vector.load %arg1[%c0, %c0_0] : memref<16x32xf32, #tpu.memory_space<vmem>>, vector<16x32xf32>
    %1 = arith.truncf %0 : vector<16x32xf32> to vector<16x32xbf16>
    %c0_1 = arith.constant 0 : index
    %c0_2 = arith.constant 0 : index
    %2 = vector.load %arg2[%c0_1, %c0_2] : memref<32x128xbf16, #tpu.memory_space<vmem>>, vector<32x128xbf16>
    %cst = arith.constant dense<0.000000e+00> : vector<16x128xf32>
    %3 = tpu.matmul %1, %2, %cst {dimension_numbers = #tpu.dot_dimension_numbers<[1], [0], [0], [1], [0, 0, 1, 1], [], []>} : vector<16x32xbf16>, vector<32x128xbf16>, vector<16x128xf32> -> vector<16x128xf32>
    %c0_3 = arith.constant 0 : index
    %c0_4 = arith.constant 0 : index
    %4 = vector.load %arg3[%c0_3, %c0_4] : memref<1x128xf32, #tpu.memory_space<vmem>>, vector<1x128xf32>
    %5 = vector.broadcast %4 : vector<1x128xf32> to vector<16x128xf32>
    %6 = arith.addf %3, %5 : vector<16x128xf32>
    %cst_5 = arith.constant 5.000000e-01 : f32
    %7 = vector.broadcast %cst_5 : f32 to vector<16x128xf32>
    %8 = arith.mulf %7, %6 : vector<16x128xf32>
    %cst_6 = arith.constant 4.471500e-02 : f32
    %9 = vector.broadcast %cst_6 : f32 to vector<16x128xf32>
    %10 = arith.mulf %9, %6 : vector<16x128xf32>
    %11 = arith.mulf %10, %6 : vector<16x128xf32>
    %12 = arith.mulf %11, %6 : vector<16x128xf32>
    %13 = arith.addf %6, %12 : vector<16x128xf32>
    %cst_7 = arith.constant 0.797884583 : f32
    %14 = vector.broadcast %cst_7 : f32 to vector<16x128xf32>
    %15 = arith.mulf %14, %13 : vector<16x128xf32>
    %16 = math.tanh %15 : vector<16x128xf32>
    %cst_8 = arith.constant 1.000000e+00 : f32
    %17 = vector.broadcast %cst_8 : f32 to vector<16x128xf32>
    %18 = arith.addf %17, %16 : vector<16x128xf32>
    %19 = arith.mulf %8, %18 : vector<16x128xf32>
    %20 = arith.truncf %19 : vector<16x128xf32> to vector<16x128xbf16>
    %c0_9 = arith.constant 0 : index
    %c0_10 = arith.constant 0 : index
    %21 = vector.load %arg4[%c0_9, %c0_10] : memref<128x32xbf16, #tpu.memory_space<vmem>>, vector<128x32xbf16>
    %cst_11 = arith.constant dense<0.000000e+00> : vector<16x32xf32>
    %22 = tpu.matmul %20, %21, %cst_11 {dimension_numbers = #tpu.dot_dimension_numbers<[1], [0], [0], [1], [0, 0, 1, 1], [], []>} : vector<16x128xbf16>, vector<128x32xbf16>, vector<16x32xf32> -> vector<16x32xf32>
    %c0_12 = arith.constant 0 : index
    %c0_13 = arith.constant 0 : index
    %23 = vector.load %arg5[%c0_12, %c0_13] : memref<1x32xf32, #tpu.memory_space<vmem>>, vector<1x32xf32>
    %24 = vector.broadcast %23 : vector<1x32xf32> to vector<16x32xf32>
    %25 = arith.addf %22, %24 : vector<16x32xf32>
    %c0_14 = arith.constant 0 : index
    %c0_15 = arith.constant 0 : index
    %26 = vector.load %arg6[%c0_14, %c0_15] : memref<16x32xf32, #tpu.memory_space<vmem>>, vector<16x32xf32>
    tpu.vector_store %arg6[%c0_14, %c0_15], %25 {strides = array<i32>} : memref<16x32xf32, #tpu.memory_space<vmem>>, vector<16x32xf32>,
    return
  }
  func.func @transform_0(%arg0: i32) -> (i32, i32) {
    %c0_i32 = arith.constant 0 : i32
    %c0_i32_0 = arith.constant 0 : i32
    return %arg0, %c0_i32 : i32, i32
  }
  func.func @transform_1(%arg0: i32) -> (i32, i32) {
    %c0_i32 = arith.constant 0 : i32
    %c0_i32_0 = arith.constant 0 : i32
    %c0_i32_1 = arith.constant 0 : i32
    return %c0_i32, %c0_i32_0 : i32, i32
  }
  func.func @transform_2(%arg0: i32) -> (i32, i32) {
    %c0_i32 = arith.constant 0 : i32
    %c0_i32_0 = arith.constant 0 : i32
    %c0_i32_1 = arith.constant 0 : i32
    return %c0_i32, %c0_i32_0 : i32, i32
  }
  func.func @transform_3(%arg0: i32) -> (i32, i32) {
    %c0_i32 = arith.constant 0 : i32
    %c0_i32_0 = arith.constant 0 : i32
    %c0_i32_1 = arith.constant 0 : i32
    return %c0_i32, %c0_i32_0 : i32, i32
  }
  func.func @transform_4(%arg0: i32) -> (i32, i32) {
    %c0_i32 = arith.constant 0 : i32
    %c0_i32_0 = arith.constant 0 : i32
    %c0_i32_1 = arith.constant 0 : i32
    return %c0_i32, %c0_i32_0 : i32, i32
  }
  func.func @transform_5(%arg0: i32) -> (i32, i32) {
    %c0_i32 = arith.constant 0 : i32
    %c0_i32_0 = arith.constant 0 : i32
    return %arg0, %c0_i32 : i32, i32
  }
}

module attributes {stable_mosaic.version = 11 : i64} {
  func.func @mlp_kernel(%arg0: i32, %arg1: memref<16x32xf32, #tpu.memory_space<vmem>>, %arg2: memref<32x128xbf16, #tpu.memory_space<vmem>>, %arg3: memref<1x128xf32, #tpu.memory_space<vmem>>, %arg4: memref<128x32xbf16, #tpu.memory_space<vmem>>, %arg5: memref<1x32xf32, #tpu.memory_space<vmem>>, %arg6: memref<16x32xf32, #tpu.memory_space<vmem>>) attributes {dimension_semantics = [#tpu.dimension_semantics<parallel>], iteration_bounds = array<i64: 1>, scalar_prefetch = 0 : i64, scratch_operands = 0 : i64, tpu.core_type = #tpu.core_type<tc>, window_params = [{transform_indices = @transform_0, window_bounds = array<i64: 16, 32>}, {pipeline_mode = #tpu.pipeline_mode<synchronous>, transform_indices = @transform_1, window_bounds = array<i64: 32, 128>}, {pipeline_mode = #tpu.pipeline_mode<synchronous>, transform_indices = @transform_2, window_bounds = array<i64: 1, 128>}, {pipeline_mode = #tpu.pipeline_mode<synchronous>, transform_indices = @transform_3, window_bounds = array<i64: 128, 32>}, {pipeline_mode = #tpu.pipeline_mode<synchronous>, transform_indices = @transform_4, window_bounds = array<i64: 1, 32>}, {transform_indices = @transform_5, window_bounds = array<i64: 16, 32>}]} {
    %c0 = arith.constant 0 : index
    %c0_0 = arith.constant 0 : index
    %0 = vector.load %arg1[%c0, %c0_0] : memref<16x32xf32, #tpu.memory_space<vmem>>, vector<16x32xf32>
    %1 = arith.truncf %0 : vector<16x32xf32> to vector<16x32xbf16>
    %c0_1 = arith.constant 0 : index
    %c0_2 = arith.constant 0 : index
    %2 = vector.load %arg2[%c0_1, %c0_2] : memref<32x128xbf16, #tpu.memory_space<vmem>>, vector<32x128xbf16>
    %cst = arith.constant dense<0.000000e+00> : vector<16x128xf32>
    %3 = tpu.matmul %1, %2, %cst {dimension_numbers = #tpu.dot_dimension_numbers<[1], [0], [0], [1], [0, 0, 1, 1], [], []>} : vector<16x32xbf16>, vector<32x128xbf16>, vector<16x128xf32> -> vector<16x128xf32>
    %c0_3 = arith.constant 0 : index
    %c0_4 = arith.constant 0 : index
    %4 = vector.load %arg3[%c0_3, %c0_4] : memref<1x128xf32, #tpu.memory_space<vmem>>, vector<1x128xf32>
    %5 = vector.broadcast %4 : vector<1x128xf32> to vector<16x128xf32>
    %6 = arith.addf %3, %5 : vector<16x128xf32>
    %cst_5 = arith.constant 5.000000e-01 : f32
    %7 = vector.broadcast %cst_5 : f32 to vector<16x128xf32>
    %8 = arith.mulf %7, %6 : vector<16x128xf32>
    %cst_6 = arith.constant 4.471500e-02 : f32
    %9 = vector.broadcast %cst_6 : f32 to vector<16x128xf32>
    %10 = arith.mulf %9, %6 : vector<16x128xf32>
    %11 = arith.mulf %10, %6 : vector<16x128xf32>
    %12 = arith.mulf %11, %6 : vector<16x128xf32>
    %13 = arith.addf %6, %12 : vector<16x128xf32>
    %cst_7 = arith.constant 0.797884583 : f32
    %14 = vector.broadcast %cst_7 : f32 to vector<16x128xf32>
    %15 = arith.mulf %14, %13 : vector<16x128xf32>
    %16 = math.tanh %15 : vector<16x128xf32>
    %cst_8 = arith.constant 1.000000e+00 : f32
    %17 = vector.broadcast %cst_8 : f32 to vector<16x128xf32>
    %18 = arith.addf %17, %16 : vector<16x128xf32>
    %19 = arith.mulf %8, %18 : vector<16x128xf32>
    %20 = arith.truncf %19 : vector<16x128xf32> to vector<16x128xbf16>
    %c0_9 = arith.constant 0 : index
    %c0_10 = arith.constant 0 : index
    %21 = vector.load %arg4[%c0_9, %c0_10] : memref<128x32xbf16, #tpu.memory_space<vmem>>, vector<128x32xbf16>
    %cst_11 = arith.constant dense<0.000000e+00> : vector<16x32xf32>
    %22 = tpu.matmul %20, %21, %cst_11 {dimension_numbers = #tpu.dot_dimension_numbers<[1], [0], [0], [1], [0, 0, 1, 1], [], []>} : vector<16x128xbf16>, vector<128x32xbf16>, vector<16x32xf32> -> vector<16x32xf32>
    %c0_12 = arith.constant 0 : index
    %c0_13 = arith.constant 0 : index
    %23 = vector.load %arg5[%c0_12, %c0_13] : memref<1x32xf32, #tpu.memory_space<vmem>>, vector<1x32xf32>
    %24 = vector.broadcast %23 : vector<1x32xf32> to vector<16x32xf32>
    %25 = arith.addf %22, %24 : vector<16x32xf32>
    %c0_14 = arith.constant 0 : index
    %c0_15 = arith.constant 0 : index
    %26 = vector.load %arg6[%c0_14, %c0_15] : memref<16x32xf32, #tpu.memory_space<vmem>>, vector<16x32xf32>
    tpu.vector_store %arg6[%c0_14, %c0_15], %25 {strides = array<i32>} : memref<16x32xf32, #tpu.memory_space<vmem>>, vector<16x32xf32>,
    return
  }
  func.func @transform_0(%arg0: i32) -> (i32, i32) {
    %c0_i32 = arith.constant 0 : i32
    %c0_i32_0 = arith.constant 0 : i32
    return %arg0, %c0_i32 : i32, i32
  }
  func.func @transform_1(%arg0: i32) -> (i32, i32) {
    %c0_i32 = arith.constant 0 : i32
    %c0_i32_0 = arith.constant 0 : i32
    %c0_i32_1 = arith.constant 0 : i32
    return %c0_i32, %c0_i32_0 : i32, i32
  }
  func.func @transform_2(%arg0: i32) -> (i32, i32) {
    %c0_i32 = arith.constant 0 : i32
    %c0_i32_0 = arith.constant 0 : i32
    %c0_i32_1 = arith.constant 0 : i32
    return %c0_i32, %c0_i32_0 : i32, i32
  }
  func.func @transform_3(%arg0: i32) -> (i32, i32) {
    %c0_i32 = arith.constant 0 : i32
    %c0_i32_0 = arith.constant 0 : i32
    %c0_i32_1 = arith.constant 0 : i32
    return %c0_i32, %c0_i32_0 : i32, i32
  }
  func.func @transform_4(%arg0: i32) -> (i32, i32) {
    %c0_i32 = arith.constant 0 : i32
    %c0_i32_0 = arith.constant 0 : i32
    %c0_i32_1 = arith.constant 0 : i32
    return %c0_i32, %c0_i32_0 : i32, i32
  }
  func.func @transform_5(%arg0: i32) -> (i32, i32) {
    %c0_i32 = arith.constant 0 : i32
    %c0_i32_0 = arith.constant 0 : i32
    return %arg0, %c0_i32 : i32, i32
  }
}

</mosaic_0001>

<bundles_post_ra>
// kernel: tpu_custom_call.1
= control target key start
LH: loop header
LB: loop body
LE: loop exit
PB: predicated region body
PF: predicated region fallthrough
CT: control target
= control target key end

     0   :  { %s351_s0 = inlined_call_operand.vmem [shape: f32[16,32], index: 0, kind: input, shape index: {}]   ;;  %s352_s1 = inlined_call_operand.vmem [shape: bf16[32,128], index: 1, kind: input, shape index: {}]   ;;  %s353_s2 = inlined_call_operand.vmem [shape: f32[1,128], index: 2, kind: input, shape index: {}]   ;;  %s354_s3 = inlined_call_operand.vmem [shape: bf16[128,32], index: 3, kind: input, shape index: {}]   ;;  %s355_s4 = inlined_call_operand.vmem [shape: f32[1,32], index: 4, kind: input, shape index: {}]   ;;  %s356_s5 = inlined_call_operand.hbm [shape: f32[16,32], index: 5, kind: output, shape index: {}]  }
   0x1   :  { %v226_v0 = vld [vmem:[%s352_s1 + $0x8] sm:$0xff]  ;;  %v225_v1 = vld [vmem:[%s352_s1] sm:$0xff] }
   0x2   :  { %v22_v2 = vld [vmem:[%s351_s0] sm:$0xff]  ;;  %55 = vmatpush.bf16.msra.mxu0 %v226_v0  ;;  %v23_v3 = vld [vmem:[%s351_s0 + $0x8] sm:$0xff] }
   0x3   :  { %10 = vsyncpa [#allocation3], 0  ;;  %v24_v4 = vpack.c.bf16 %v23_v3, %v22_v2  ;;  %vm45_vm0 = vcmask 261120   ;;  %v234_v5 = vld [vmem:[%s354_s3 + $0x38] sm:$0xff]  ;;  %v233_v6 = vld [vmem:[%s354_s3 + $0x30] sm:$0xff]  ;;  %s270_s17 = smov [#allocation2]  }
   0x4   :  { %150 = vmatpush.bf16.msra.mxu1 %v234_v5  ;;  %v232_v7 = vld [vmem:[%s354_s3 + $0x28] sm:$0xff]  ;;  %v231_v8 = vld [vmem:[%s354_s3 + $0x20] sm:$0xff]  ;;  %v230_v9 = vld [vmem:[%s354_s3 + $0x18] sm:$0xff]  ;;  %s170_s18 = sshll.u32 %s270_s17, 4  ;;  %s172_s21 = sshll.u32 %s356_s5, 4  ;;  %s171_s18 = int_to_ptr.vmem [resolvable:$true] %s170_s18  ;;  %s173_s21 = int_to_ptr.hbm [resolvable:$true] %s172_s21 }
   0x5   :  { %v229_v10 = vld [vmem:[%s354_s3 + $0x10] sm:$0xff]  ;;  %v228_v11 = vld [vmem:[%s354_s3 + $0x8] sm:$0xff]  ;;  %v227_v12 = vld [vmem:[%s354_s3] sm:$0xff]  ;;  %s271_s22 = smov 128   ;;  %s272_s23 = smov 8  }
   0x6   :  { %56 = vmatpush.bf16.msra.mxu0 %v225_v1  ;;  %v238_v13 = vld [vmem:[%s353_s2] ss:$0 sm:$0xff] }
   0x7   :  { %v239_v37 = vld [vmem:[%s355_s4] ss:$0 sm:$0xff] }
   0x8   :  { %151 = vmatpush.bf16.msra.mxu1 %v233_v6 }
   0x9   :  { %192 = vmatmul.msk.bf16.vlgmr.msra.gmra.mxu0 %vm45_vm0, %v24_v4 }
   0xc   :  { %152 = vmatpush.bf16.msra.mxu1 %v232_v7 }
  0x10   :  { %153 = vmatpush.bf16.msra.mxu1 %v231_v8 }
  0x14   :  { %154 = vmatpush.bf16.msra.mxu1 %v230_v9 }
  0x18   :  { %155 = vmatpush.bf16.msra.mxu1 %v229_v10 }
  0x1c   :  { %156 = vmatpush.bf16.msra.mxu1 %v228_v11 }
  0x20   :  { %157 = vmatpush.bf16.msra.mxu1 %v227_v12 }
  0x86   :  { %v58_v14 = vpop.f32.mrf.mxu0 }
  0x87   :  { %v59_v15 = vadd.f32 %v238_v13, %v58_v14 }
  0x89   :  { %v65_v16 = vmul.f32 0.044715, %v59_v15  ;;  %v63_v31 = vmul.f32 0.5, %v59_v15 }
  0x8b   :  { %v67_v17 = vmul.f32 %v65_v16, %v59_v15 }
  0x8d   :  { %v69_v18 = vmul.f32 %v67_v17, %v59_v15 }
  0x8e   :  { %v60_v19 = vpop.f32.mrf.mxu0 }
  0x8f   :  { %v61_v20 = vadd.f32 %v238_v13, %v60_v19  ;;  %v71_v21 = vadd.f32 %v69_v18, %v59_v15 }
  0x91   :  { %v66_v22 = vmul.f32 0.044715, %v61_v20  ;;  %v73_v24 = vmul.f32 0.7978846, %v71_v21  ;;  %v64_v32 = vmul.f32 0.5, %v61_v20 }
  0x93   :  { %v68_v23 = vmul.f32 %v66_v22, %v61_v20  ;;  %240 = vtanh.f32 %v73_v24 }
  0x95   :  { %v70_v25 = vmul.f32 %v68_v23, %v61_v20 }
  0x97   :  { %v72_v26 = vadd.f32 %v70_v25, %v61_v20 }
  0x99   :  { %v74_v27 = vmul.f32 0.7978846, %v72_v26  ;;  %v241_v28 = vpop.eup %240 }
  0x9a   :  { %v77_v29 = vadd.f32 1.0, %v241_v28 }
  0x9b   :  { %242 = vtanh.f32 %v74_v27 }
  0x9c   :  { %v79_v34 = vmul.f32 %v77_v29, %v63_v31 }
  0xa1   :  { %v243_v30 = vpop.eup %242 }
  0xa2   :  { %v78_v33 = vadd.f32 1.0, %v243_v30 }
  0xa4   :  { %v80_v35 = vmul.f32 %v78_v33, %v64_v32 }
  0xa6   :  { %v81_v36 = vpack.c.bf16 %v80_v35, %v79_v34 }
  0xa8   :  { %158 = vmatmul.bf16.vlgmr.msra.gmra.mxu1 %v81_v36 }
 0x125   :  { %v159_v38 = vpop.f32.mrf.mxu1 }
 0x126   :  { %v160_v39 = vadd.f32 %v239_v37, %v159_v38 }
 0x128   :  { %164 = vst.msk [vmem:[#allocation2] sm:$0xff] %vm45_vm0, %v160_v39 }
 0x12d   :  { %v161_v40 = vpop.f32.mrf.mxu1 }
 0x12e   :  { %v162_v41 = vadd.f32 %v239_v37, %v161_v40 }
 0x130   :  { %165 = vst.msk [vmem:[#allocation2 + $0x8] sm:$0xff] %vm45_vm0, %v162_v41 }
 0x131   :  { %178 = dma.vmem_to_hbm [thread:$0]  %s171_s18, 256, %s173_s21, [#allocation3], %s271_s22, %s271_s22, %s272_s23  }
 0x132   :  { %268 = dma.done.wait [#allocation3], 256  }
 0x133   :  { %269 = vsyncadd [#allocation3], 4294967040 }
 0x134   :  { %183 = vsyncpa [#allocation3], 1 }

// kernel: tpu_custom_call.1
= control target key start
LH: loop header
LB: loop body
LE: loop exit
PB: predicated region body
PF: predicated region fallthrough
CT: control target
= control target key end

     0   :  { %s351_s0 = inlined_call_operand.vmem [shape: f32[16,32], index: 0, kind: input, shape index: {}]   ;;  %s352_s1 = inlined_call_operand.vmem [shape: bf16[32,128], index: 1, kind: input, shape index: {}]   ;;  %s353_s2 = inlined_call_operand.vmem [shape: f32[1,128], index: 2, kind: input, shape index: {}]   ;;  %s354_s3 = inlined_call_operand.vmem [shape: bf16[128,32], index: 3, kind: input, shape index: {}]   ;;  %s355_s4 = inlined_call_operand.vmem [shape: f32[1,32], index: 4, kind: input, shape index: {}]   ;;  %s356_s5 = inlined_call_operand.hbm [shape: f32[16,32], index: 5, kind: output, shape index: {}]  }
   0x1   :  { %v226_v0 = vld [vmem:[%s352_s1 + $0x8] sm:$0xff]  ;;  %v225_v1 = vld [vmem:[%s352_s1] sm:$0xff] }
   0x2   :  { %v22_v2 = vld [vmem:[%s351_s0] sm:$0xff]  ;;  %55 = vmatpush.bf16.msra.mxu0 %v226_v0  ;;  %v23_v3 = vld [vmem:[%s351_s0 + $0x8] sm:$0xff] }
   0x3   :  { %10 = vsyncpa [#allocation3], 0  ;;  %v24_v4 = vpack.c.bf16 %v23_v3, %v22_v2  ;;  %vm45_vm0 = vcmask 261120   ;;  %v234_v5 = vld [vmem:[%s354_s3 + $0x38] sm:$0xff]  ;;  %v233_v6 = vld [vmem:[%s354_s3 + $0x30] sm:$0xff]  ;;  %s270_s17 = smov [#allocation2]  }
   0x4   :  { %150 = vmatpush.bf16.msra.mxu1 %v234_v5  ;;  %v232_v7 = vld [vmem:[%s354_s3 + $0x28] sm:$0xff]  ;;  %v231_v8 = vld [vmem:[%s354_s3 + $0x20] sm:$0xff]  ;;  %v230_v9 = vld [vmem:[%s354_s3 + $0x18] sm:$0xff]  ;;  %s170_s18 = sshll.u32 %s270_s17, 4  ;;  %s172_s21 = sshll.u32 %s356_s5, 4  ;;  %s171_s18 = int_to_ptr.vmem [resolvable:$true] %s170_s18  ;;  %s173_s21 = int_to_ptr.hbm [resolvable:$true] %s172_s21 }
   0x5   :  { %v229_v10 = vld [vmem:[%s354_s3 + $0x10] sm:$0xff]  ;;  %v228_v11 = vld [vmem:[%s354_s3 + $0x8] sm:$0xff]  ;;  %v227_v12 = vld [vmem:[%s354_s3] sm:$0xff]  ;;  %s271_s22 = smov 128   ;;  %s272_s23 = smov 8  }
   0x6   :  { %56 = vmatpush.bf16.msra.mxu0 %v225_v1  ;;  %v238_v13 = vld [vmem:[%s353_s2] ss:$0 sm:$0xff] }
   0x7   :  { %v239_v37 = vld [vmem:[%s355_s4] ss:$0 sm:$0xff] }
   0x8   :  { %151 = vmatpush.bf16.msra.mxu1 %v233_v6 }
   0x9   :  { %192 = vmatmul.msk.bf16.vlgmr.msra.gmra.mxu0 %vm45_vm0, %v24_v4 }
   0xc   :  { %152 = vmatpush.bf16.msra.mxu1 %v232_v7 }
  0x10   :  { %153 = vmatpush.bf16.msra.mxu1 %v231_v8 }
  0x14   :  { %154 = vmatpush.bf16.msra.mxu1 %v230_v9 }
  0x18   :  { %155 = vmatpush.bf16.msra.mxu1 %v229_v10 }
  0x1c   :  { %156 = vmatpush.bf16.msra.mxu1 %v228_v11 }
  0x20   :  { %157 = vmatpush.bf16.msra.mxu1 %v227_v12 }
  0x86   :  { %v58_v14 = vpop.f32.mrf.mxu0 }
  0x87   :  { %v59_v15 = vadd.f32 %v238_v13, %v58_v14 }
  0x89   :  { %v65_v16 = vmul.f32 0.044715, %v59_v15  ;;  %v63_v31 = vmul.f32 0.5, %v59_v15 }
  0x8b   :  { %v67_v17 = vmul.f32 %v65_v16, %v59_v15 }
  0x8d   :  { %v69_v18 = vmul.f32 %v67_v17, %v59_v15 }
  0x8e   :  { %v60_v19 = vpop.f32.mrf.mxu0 }
  0x8f   :  { %v61_v20 = vadd.f32 %v238_v13, %v60_v19  ;;  %v71_v21 = vadd.f32 %v69_v18, %v59_v15 }
  0x91   :  { %v66_v22 = vmul.f32 0.044715, %v61_v20  ;;  %v73_v24 = vmul.f32 0.7978846, %v71_v21  ;;  %v64_v32 = vmul.f32 0.5, %v61_v20 }
  0x93   :  { %v68_v23 = vmul.f32 %v66_v22, %v61_v20  ;;  %240 = vtanh.f32 %v73_v24 }
  0x95   :  { %v70_v25 = vmul.f32 %v68_v23, %v61_v20 }
  0x97   :  { %v72_v26 = vadd.f32 %v70_v25, %v61_v20 }
  0x99   :  { %v74_v27 = vmul.f32 0.7978846, %v72_v26  ;;  %v241_v28 = vpop.eup %240 }
  0x9a   :  { %v77_v29 = vadd.f32 1.0, %v241_v28 }
  0x9b   :  { %242 = vtanh.f32 %v74_v27 }
  0x9c   :  { %v79_v34 = vmul.f32 %v77_v29, %v63_v31 }
  0xa1   :  { %v243_v30 = vpop.eup %242 }
  0xa2   :  { %v78_v33 = vadd.f32 1.0, %v243_v30 }
  0xa4   :  { %v80_v35 = vmul.f32 %v78_v33, %v64_v32 }
  0xa6   :  { %v81_v36 = vpack.c.bf16 %v80_v35, %v79_v34 }
  0xa8   :  { %158 = vmatmul.bf16.vlgmr.msra.gmra.mxu1 %v81_v36 }
 0x125   :  { %v159_v38 = vpop.f32.mrf.mxu1 }
 0x126   :  { %v160_v39 = vadd.f32 %v239_v37, %v159_v38 }
 0x128   :  { %164 = vst.msk [vmem:[#allocation2] sm:$0xff] %vm45_vm0, %v160_v39 }
 0x12d   :  { %v161_v40 = vpop.f32.mrf.mxu1 }
 0x12e   :  { %v162_v41 = vadd.f32 %v239_v37, %v161_v40 }
 0x130   :  { %165 = vst.msk [vmem:[#allocation2 + $0x8] sm:$0xff] %vm45_vm0, %v162_v41 }
 0x131   :  { %178 = dma.vmem_to_hbm [thread:$0]  %s171_s18, 256, %s173_s21, [#allocation3], %s271_s22, %s271_s22, %s272_s23  }
 0x132   :  { %268 = dma.done.wait [#allocation3], 256  }
 0x133   :  { %269 = vsyncadd [#allocation3], 4294967040 }
 0x134   :  { %183 = vsyncpa [#allocation3], 1 }

</bundles_post_ra>
